<compile_context>
chip_gen: v7x
topology: tpu7x:2x2x1
jax: 0.10.0
libtpu: 0.0.40
codegen_flags: <defaults>
</compile_context>

<pallas_src>
import functools

import jax
import jax.numpy as jnp
from jax.experimental import pallas as pl
from jax.experimental.pallas import tpu as pltpu

BN_EPS = 1e-5


def _round_up(v, m):
    return ((v + m - 1) // m) * m


# ---------------------------------------------------------------------------
# In-kernel helper: 3x3 "same" conv of the current row band as ONE MXU matmul.
# ---------------------------------------------------------------------------
def _conv1_band(band_ref, top_ref, bot_ref, w1_ref, im2_ref, *, W, P, halo):
    """Returns (Cout, P) f32 conv1 activations for the current band.

    band_ref: (1, Cin, P)    current band, pixels (row-major) on lanes.
    top_ref:  (1, Cin, halo) the `halo` pixels immediately before the band
              (garbage for the first band - always masked there).
    bot_ref:  (1, Cin, halo) the `halo` pixels immediately after the band.
    w1_ref:   (Cout, 9*Cin)  conv1 weight, tap-major then channel.
    im2_ref:  (9*Cin, P)     VMEM scratch for the im2col slab.
    """
    band = band_ref[0]                                        # (Cin, P)
    cin = band.shape[0]
    # halo | band | halo, all lane-dense: static slices below stay in range.
    ext = jnp.concatenate([top_ref[0], band, bot_ref[0]], axis=-1)

    h = pl.program_id(1)
    is_first = h == 0
    is_last = h == pl.num_programs(1) - 1

    pix = jax.lax.broadcasted_iota(jnp.int32, (1, P), 1)
    if (W & (W - 1)) == 0:                                    # power-of-two W
        col = jnp.bitwise_and(pix, W - 1)
    else:
        col = jax.lax.rem(pix, W)
    not_left = col > 0                                        # dx == 0 taps
    not_right = col < (W - 1)                                 # dx == 2 taps
    # Vertical neighbours only miss at the global image border (first/last
    # image row); interior band borders are covered by the spliced halos.
    not_top = jnp.logical_or(jnp.logical_not(is_first), pix >= W)
    not_bot = jnp.logical_or(jnp.logical_not(is_last), pix < (P - W))

    row_masks = (not_top, None, not_bot)
    col_masks = (not_left, None, not_right)
    for dy in range(3):
        for dx in range(3):
            off = (dy - 1) * W + (dx - 1)
            slab = ext[:, halo + off: halo + off + P]          # (Cin, P)
            mask = row_masks[dy]
            if col_masks[dx] is not None:
                mask = col_masks[dx] if mask is None else jnp.logical_and(
                    mask, col_masks[dx])
            if mask is not None:
                slab = jnp.where(mask, slab, 0.0)
            t = dy * 3 + dx
            im2_ref[t * cin:(t + 1) * cin, :] = slab

    # Single MXU matmul: (Cout, 9*Cin) @ (9*Cin, P) -> (Cout, P)
    return jnp.dot(w1_ref[...], im2_ref[...], preferred_element_type=jnp.float32)


# ---------------------------------------------------------------------------
# Pass 1: per-batch partial BatchNorm statistics (centered per band)
# ---------------------------------------------------------------------------
def _stats_kernel(band_ref, top_ref, bot_ref, w1_ref, stats_ref, im2_ref,
                  *, W, P, halo):
    @pl.when(pl.program_id(1) == 0)
    def _():
        stats_ref[...] = jnp.zeros_like(stats_ref)

    y = _conv1_band(band_ref, top_ref, bot_ref, w1_ref, im2_ref,
                    W=W, P=P, halo=halo)                       # (Cout, P)

    s = jnp.sum(y, axis=1, keepdims=True)                      # band sum
    mu = s * jnp.float32(1.0 / P)                              # band mean
    c = y - mu
    q = jnp.sum(c * c, axis=1, keepdims=True)                  # centered SS
    u = (mu * mu) * jnp.float32(P)                             # P * mean_b^2

    stats_ref[0, :, 0:1] += s
    stats_ref[0, :, 1:2] += q
    stats_ref[0, :, 2:3] += u


# ---------------------------------------------------------------------------
# Pass 2: BN/ReLU, 1x1 conv, ReLU, sigmoid, residual update
# ---------------------------------------------------------------------------
def _apply_kernel(band_ref, top_ref, bot_ref, w1_ref, scale_ref, bias_ref,
                  w2t_ref, out_ref, att_ref, im2_ref, *, W, P, halo):
    y = _conv1_band(band_ref, top_ref, bot_ref, w1_ref, im2_ref,
                    W=W, P=P, halo=halo)                       # (Cout, P)
    y = jnp.maximum(y * scale_ref[...] + bias_ref[...], 0.0)   # BN + ReLU

    # 1x1 conv:  (Cin, Cout) @ (Cout, P) -> (Cin, P), ReLU, sigmoid.
    z = jnp.dot(w2t_ref[...], y, preferred_element_type=jnp.float32)
    att = jax.nn.sigmoid(jnp.maximum(z, 0.0))

    res = band_ref[0]                                          # residual tile
    out_ref[0] = res * (att + 1.0)                             # res*att + res
    att_ref[0] = att


# ---------------------------------------------------------------------------
# Tile selection with an honest (padded) VMEM footprint model
# ---------------------------------------------------------------------------
def _footprint_bytes(cin, cout, p, halo):
    def pad(r, c):
        return _round_up(max(r, 1), 8) * _round_up(max(c, 1), 128) * 4

    band = pad(cin, p)
    hal = pad(cin, halo)
    io = 2 * (band + 2 * hal)                 # band + 2 halos, double-buffered
    io += 2 * 2 * band                        # out + att blocks, double-buffered
    params = pad(cout, 9 * cin) + 2 * pad(cout, 1) + pad(cin, cout)
    scratch = pad(9 * cin, p)                 # im2col scratch
    temps = pad(cin, p + 2 * halo) + pad(cout, p) + 2 * pad(cin, p)
    return io + params + scratch + temps


def _halo_lanes(H, W):
    return min(_round_up(W + 1, 128), H * W)


def _pick_band(H, W, cin, cout, budget):
    """Largest whole-row band P = TH*W (TH | H, P % halo == 0 unless single
    band) whose padded footprint fits the budget."""
    halo = _halo_lanes(H, W)
    cands = []
    for tr in range(1, H + 1):
        if H % tr:
            continue
        p = tr * W
        if (H // tr) > 1 and p % halo:
            continue
        cands.append(p)
    fitting = [p for p in cands if _footprint_bytes(cin, cout, p, halo) <= budget]
    return (max(fitting) if fitting else min(cands)), halo


# ---------------------------------------------------------------------------
# Wrapper
# ---------------------------------------------------------------------------
def spatial_atten(x_nchw, w1, gamma, beta, w2, *, tile_rows=None,
                  vmem_budget_bytes=8 << 20):
    """SpatialAtten forward.

    x_nchw: (N, Cin, H, W)
    w1:     (3, 3, Cin, Cout) conv1 weight, HWIO layout
    gamma, beta: (Cout,) BatchNorm affine params
    w2:     (Cout, Cin) conv2 1x1 weight (out channel d = sum_o y_o * w2[o, d])
    Returns (x_out, spatial_att), both (N, Cin, H, W) float32.
    """
    N, Cin, H, W = x_nchw.shape
    Cout = w1.shape[-1]
    if H < 2:
        raise ValueError("spatial_atten requires H >= 2")
    HW = H * W
    x = x_nchw.astype(jnp.float32)

    if tile_rows is None:
        P, halo = _pick_band(H, W, Cin, Cout, vmem_budget_bytes)
    else:
        halo = _halo_lanes(H, W)
        P = tile_rows * W
        if H % tile_rows or ((H // tile_rows) > 1 and P % halo):
            raise ValueError(f"invalid tile_rows={tile_rows} for H={H}, W={W}")
    HB = HW // P
    nb_halo = HW // halo

    # Input / residual / outputs: lane-dense (N, Cin, H*W) = free NCHW view.
    x_flat = x.reshape(N, Cin, HW)

    # conv1 weight as (Cout, 9*Cin), tap-major then channel (matches im2col).
    w1_flat = jnp.transpose(w1.astype(jnp.float32), (3, 0, 1, 2)).reshape(
        Cout, 9 * Cin)
    w2t = jnp.transpose(w2.astype(jnp.float32), (1, 0))        # (Cin, Cout)

    # BlockSpecs -------------------------------------------------------------
    band_spec = pl.BlockSpec((1, Cin, P), lambda n, h: (n, 0, h))
    top_spec = pl.BlockSpec(
        (1, Cin, halo),
        lambda n, h: (n, 0, jnp.maximum(h * (P // halo) - 1, 0)))
    bot_spec = pl.BlockSpec(
        (1, Cin, halo),
        lambda n, h: (n, 0, jnp.minimum((h + 1) * (P // halo), nb_halo - 1)))
    w1_spec = pl.BlockSpec((Cout, 9 * Cin), lambda n, h: (0, 0))
    vec_spec = pl.BlockSpec((Cout, 1), lambda n, h: (0, 0))
    w2_spec = pl.BlockSpec((Cin, Cout), lambda n, h: (0, 0))
    pix_spec = pl.BlockSpec((1, Cin, P), lambda n, h: (n, 0, h))
    stats_spec = pl.BlockSpec((1, Cout, 3), lambda n, h: (n, 0, 0))

    fp = _footprint_bytes(Cin, Cout, P, halo)
    cp_kwargs = {}
    if fp > (12 << 20):
        cp_kwargs["vmem_limit_bytes"] = int(min(max(2 * fp, 16 << 20), 48 << 20))

    # Pass 1: per-batch partial BN statistics (batch axis parallel) ----------
    partial_stats = pl.pallas_call(
        functools.partial(_stats_kernel, W=W, P=P, halo=halo),
        grid=(N, HB),
        in_specs=[band_spec, top_spec, bot_spec, w1_spec],
        out_specs=stats_spec,
        out_shape=jax.ShapeDtypeStruct((N, Cout, 3), jnp.float32),
        scratch_shapes=[pltpu.VMEM((9 * Cin, P), jnp.float32)],
        compiler_params=pltpu.CompilerParams(
            dimension_semantics=("parallel", "arbitrary"), **cp_kwargs),
    )(x_flat, x_flat, x_flat, w1_flat)

    # Tiny merge (Chan-style) + fold gamma/beta into fused scale/bias --------
    n_pix = jnp.float32(N * HW)
    s = jnp.sum(partial_stats[:, :, 0], axis=0)
    q = jnp.sum(partial_stats[:, :, 1], axis=0)
    u = jnp.sum(partial_stats[:, :, 2], axis=0)
    mean = s / n_pix
    var = (q + u) / n_pix - mean * mean          # biased batch variance
    inv_std = jax.lax.rsqrt(var + BN_EPS)
    g32 = gamma.astype(jnp.float32)
    scale = (g32 * inv_std).reshape(Cout, 1)
    bias = (beta.astype(jnp.float32) - mean * g32 * inv_std).reshape(Cout, 1)

    # Pass 2: BN/ReLU, 1x1 conv, sigmoid, residual update ---------------------
    out_flat, att_flat = pl.pallas_call(
        functools.partial(_apply_kernel, W=W, P=P, halo=halo),
        grid=(N, HB),
        in_specs=[band_spec, top_spec, bot_spec, w1_spec, vec_spec, vec_spec,
                  w2_spec],
        out_specs=(pix_spec, pix_spec),
        out_shape=(jax.ShapeDtypeStruct((N, Cin, HW), jnp.float32),
                   jax.ShapeDtypeStruct((N, Cin, HW), jnp.float32)),
        scratch_shapes=[pltpu.VMEM((9 * Cin, P), jnp.float32)],
        compiler_params=pltpu.CompilerParams(
            dimension_semantics=("parallel", "parallel"), **cp_kwargs),
    )(x_flat, x_flat, x_flat, w1_flat, scale, bias, w2t)

    out = out_flat.reshape(N, Cin, H, W)         # already NCHW: free reshape
    att = att_flat.reshape(N, Cin, H, W)
    return out, att


# ---------------------------------------------------------------------------
# Pure-JAX reference mirroring the PyTorch forward
# ---------------------------------------------------------------------------
def reference_forward(x_nchw, w1, gamma, beta, w2):
    x = jnp.transpose(x_nchw, (0, 2, 3, 1)).astype(jnp.float32)
    y = jax.lax.conv_general_dilated(
        x, w1.astype(jnp.float32), window_strides=(1, 1), padding="SAME",
        dimension_numbers=("NHWC", "HWIO", "NHWC"))
    mean = y.mean(axis=(0, 1, 2))
    var = jnp.mean(jnp.square(y - mean), axis=(0, 1, 2))
    y = (y - mean) / jnp.sqrt(var + BN_EPS) * gamma + beta
    y = jnp.maximum(y, 0.0)
    z = jnp.maximum(jnp.einsum("nhwc,cd->nhwd", y, w2.astype(jnp.float32)), 0.0)
    att = jax.nn.sigmoid(z)
    out = x * att + x
    return (jnp.transpose(out, (0, 3, 1, 2)), jnp.transpose(att, (0, 3, 1, 2)))


if __name__ == "__main__":
    key = jax.random.PRNGKey(0)
    keys = jax.random.split(key, 6)

    # --- config 1: module-sized toy shapes, forced 2-band tiling ------------
    # (exercises halo splicing + cross-band stats accumulation)
    N, Cin, H, W = 2, 4, 16, 16       # in_size = 4
    Cout = 8                          # out_size = 8
    x = jax.random.normal(keys[0], (N, Cin, H, W), dtype=jnp.float32)
    w1 = 0.3 * jax.random.normal(keys[1], (3, 3, Cin, Cout), dtype=jnp.float32)
    gamma = 1.0 + 0.1 * jnp.arange(Cout, dtype=jnp.float32)
    beta = 0.05 * jnp.arange(Cout, dtype=jnp.float32)
    w2 = 0.3 * jax.random.normal(keys[2], (Cout, Cin), dtype=jnp.float32)

    out, att = spatial_atten(x, w1, gamma, beta, w2, tile_rows=8)
    out = jax.block_until_ready(out)
    att = jax.block_until_ready(att)

    ref_out, ref_att = reference_forward(x, w1, gamma, beta, w2)
    assert out.shape == (N, Cin, H, W) and att.shape == (N, Cin, H, W)
    assert jnp.allclose(out, ref_out, rtol=2e-3, atol=2e-3), \
        float(jnp.max(jnp.abs(out - ref_out)))
    assert jnp.allclose(att, ref_att, rtol=2e-3, atol=2e-3), \
        float(jnp.max(jnp.abs(att - ref_att)))

    # --- config 2: odd channel counts, auto band pick (single-band path) ----
    N2, C2, H2, W2, Co2 = 1, 3, 8, 16, 5
    x2 = jax.random.normal(keys[3], (N2, C2, H2, W2), dtype=jnp.float32)
    w1b = 0.3 * jax.random.normal(keys[4], (3, 3, C2, Co2), dtype=jnp.float32)
    gb = 1.0 + 0.1 * jnp.arange(Co2, dtype=jnp.float32)
    bb = -0.02 * jnp.arange(Co2, dtype=jnp.float32)
    w2b = 0.3 * jax.random.normal(keys[5], (Co2, C2), dtype=jnp.float32)

    out2, att2 = spatial_atten(x2, w1b, gb, bb, w2b)
    out2 = jax.block_until_ready(out2)
    att2 = jax.block_until_ready(att2)
    r_out2, r_att2 = reference_forward(x2, w1b, gb, bb, w2b)
    assert jnp.allclose(out2, r_out2, rtol=2e-3, atol=2e-3), \
        float(jnp.max(jnp.abs(out2 - r_out2)))
    assert jnp.allclose(att2, r_att2, rtol=2e-3, atol=2e-3), \
        float(jnp.max(jnp.abs(att2 - r_att2)))

    print("KERNEL_OK")
</pallas_src>

<mosaic_0001>
module attributes {stable_mosaic.version = 11 : i64} {
  func.func @_stats_kernel(%arg0: i32, %arg1: i32, %arg2: memref<1x4x128xf32, #tpu.memory_space<vmem>>, %arg3: memref<1x4x128xf32, #tpu.memory_space<vmem>>, %arg4: memref<1x4x128xf32, #tpu.memory_space<vmem>>, %arg5: memref<8x36xf32, #tpu.memory_space<vmem>>, %arg6: memref<1x8x3xf32, #tpu.memory_space<vmem>>, %arg7: memref<36x128xf32, #tpu.memory_space<vmem>>) attributes {dimension_semantics = [#tpu.dimension_semantics<parallel>, #tpu.dimension_semantics<arbitrary>], iteration_bounds = array<i64: 2, 2>, scalar_prefetch = 0 : i64, scratch_operands = 1 : i64, tpu.core_type = #tpu.core_type<tc>, window_params = [{transform_indices = @transform_0, window_bounds = array<i64: 1, 4, 128>}, {transform_indices = @transform_1, window_bounds = array<i64: 1, 4, 128>}, {transform_indices = @transform_2, window_bounds = array<i64: 1, 4, 128>}, {pipeline_mode = #tpu.pipeline_mode<synchronous>, transform_indices = @transform_3, window_bounds = array<i64: 8, 36>}, {transform_indices = @transform_4, window_bounds = array<i64: 1, 8, 3>}]} {
    %c0_i32 = arith.constant 0 : i32
    %0 = arith.cmpi eq, %arg1, %c0_i32 : i32
    %1 = arith.extui %0 : i1 to i32
    %c0_i32_0 = arith.constant 0 : i32
    %2 = arith.cmpi ne, %1, %c0_i32_0 : i32
    scf.if %2 {
      %cst_55 = arith.constant 0.000000e+00 : f32
      %116 = vector.broadcast %cst_55 : f32 to vector<1x8x3xf32>
      %c0_56 = arith.constant 0 : index
      %c0_57 = arith.constant 0 : index
      %c0_58 = arith.constant 0 : index
      %117 = vector.load %arg6[%c0_56, %c0_57, %c0_58] : memref<1x8x3xf32, #tpu.memory_space<vmem>>, vector<1x8x3xf32>
      tpu.vector_store %arg6[%c0_56, %c0_57, %c0_58], %116 {strides = array<i32>} : memref<1x8x3xf32, #tpu.memory_space<vmem>>, vector<1x8x3xf32>,
    } else {
    }
    %c0 = arith.constant 0 : index
    %c0_1 = arith.constant 0 : index
    %c0_2 = arith.constant 0 : index
    %3 = vector.load %arg2[%c0, %c0_1, %c0_2] : memref<1x4x128xf32, #tpu.memory_space<vmem>>, vector<1x4x128xf32>
    %4 = vector.shape_cast %3 : vector<1x4x128xf32> to vector<4x128xf32>
    %c0_3 = arith.constant 0 : index
    %c0_4 = arith.constant 0 : index
    %c0_5 = arith.constant 0 : index
    %5 = vector.load %arg3[%c0_3, %c0_4, %c0_5] : memref<1x4x128xf32, #tpu.memory_space<vmem>>, vector<1x4x128xf32>
    %6 = vector.shape_cast %5 : vector<1x4x128xf32> to vector<4x128xf32>
    %c0_6 = arith.constant 0 : index
    %c0_7 = arith.constant 0 : index
    %c0_8 = arith.constant 0 : index
    %7 = vector.load %arg4[%c0_6, %c0_7, %c0_8] : memref<1x4x128xf32, #tpu.memory_space<vmem>>, vector<1x4x128xf32>
    %8 = vector.shape_cast %7 : vector<1x4x128xf32> to vector<4x128xf32>
    %9 = tpu.concatenate %6, %4, %8 in 1 : vector<4x128xf32>, vector<4x128xf32>, vector<4x128xf32> -> vector<4x384xf32>
    %c0_i32_9 = arith.constant 0 : i32
    %10 = arith.cmpi eq, %arg1, %c0_i32_9 : i32
    %c1_i32 = arith.constant 1 : i32
    %11 = arith.cmpi eq, %arg1, %c1_i32 : i32
    %12 = tpu.iota {dimensions = array<i32: 1>} : vector<1x128xi32>
    %c15_i32 = arith.constant 15 : i32
    %13 = vector.broadcast %c15_i32 : i32 to vector<1x128xi32>
    %14 = arith.andi %12, %13 : vector<1x128xi32>
    %c0_i32_10 = arith.constant 0 : i32
    %15 = vector.broadcast %c0_i32_10 : i32 to vector<1x128xi32>
    %16 = arith.cmpi sgt, %14, %15 : vector<1x128xi32>
    %c15_i32_11 = arith.constant 15 : i32
    %17 = vector.broadcast %c15_i32_11 : i32 to vector<1x128xi32>
    %18 = arith.cmpi slt, %14, %17 : vector<1x128xi32>
    %true = arith.constant true
    %19 = arith.xori %10, %true : i1
    %c16_i32 = arith.constant 16 : i32
    %20 = vector.broadcast %c16_i32 : i32 to vector<1x128xi32>
    %21 = arith.cmpi sge, %12, %20 : vector<1x128xi32>
    %22 = vector.broadcast %19 : i1 to vector<1x128xi1>
    %23 = arith.ori %22, %21 : vector<1x128xi1>
    %true_12 = arith.constant true
    %24 = arith.xori %11, %true_12 : i1
    %c112_i32 = arith.constant 112 : i32
    %25 = vector.broadcast %c112_i32 : i32 to vector<1x128xi32>
    %26 = arith.cmpi slt, %12, %25 : vector<1x128xi32>
    %27 = vector.broadcast %24 : i1 to vector<1x128xi1>
    %28 = arith.ori %27, %26 : vector<1x128xi1>
    %29 = vector.extract_strided_slice %9 {offsets = [0, 111], sizes = [4, 128], strides = [1, 1]} : vector<4x384xf32> to vector<4x128xf32>
    %30 = arith.andi %23, %16 : vector<1x128xi1>
    %cst = arith.constant 0.000000e+00 : f32
    %31 = vector.shape_cast %30 : vector<1x128xi1> to vector<1x128xi1>
    %32 = vector.broadcast %31 : vector<1x128xi1> to vector<4x128xi1>
    %33 = vector.broadcast %cst : f32 to vector<4x128xf32>
    %34 = arith.select %32, %29, %33 : vector<4x128xi1>, vector<4x128xf32>
    %c0_13 = arith.constant 0 : index
    %c0_14 = arith.constant 0 : index
    %35 = vector.load %arg7[%c0_13, %c0_14] : memref<36x128xf32, #tpu.memory_space<vmem>>, vector<4x128xf32>
    tpu.vector_store %arg7[%c0_13, %c0_14], %34 {strides = array<i32>} : memref<36x128xf32, #tpu.memory_space<vmem>>, vector<4x128xf32>,
    %36 = vector.extract_strided_slice %9 {offsets = [0, 112], sizes = [4, 128], strides = [1, 1]} : vector<4x384xf32> to vector<4x128xf32>
    %cst_15 = arith.constant 0.000000e+00 : f32
    %37 = vector.shape_cast %23 : vector<1x128xi1> to vector<1x128xi1>
    %38 = vector.broadcast %37 : vector<1x128xi1> to vector<4x128xi1>
    %39 = vector.broadcast %cst_15 : f32 to vector<4x128xf32>
    %40 = arith.select %38, %36, %39 : vector<4x128xi1>, vector<4x128xf32>
    %c4 = arith.constant 4 : index
    %c0_16 = arith.constant 0 : index
    %41 = vector.load %arg7[%c4, %c0_16] : memref<36x128xf32, #tpu.memory_space<vmem>>, vector<4x128xf32>
    tpu.vector_store %arg7[%c4, %c0_16], %40 {strides = array<i32>} : memref<36x128xf32, #tpu.memory_space<vmem>>, vector<4x128xf32>,
    %42 = vector.extract_strided_slice %9 {offsets = [0, 113], sizes = [4, 128], strides = [1, 1]} : vector<4x384xf32> to vector<4x128xf32>
    %43 = arith.andi %23, %18 : vector<1x128xi1>
    %cst_17 = arith.constant 0.000000e+00 : f32
    %44 = vector.shape_cast %43 : vector<1x128xi1> to vector<1x128xi1>
    %45 = vector.broadcast %44 : vector<1x128xi1> to vector<4x128xi1>
    %46 = vector.broadcast %cst_17 : f32 to vector<4x128xf32>
    %47 = arith.select %45, %42, %46 : vector<4x128xi1>, vector<4x128xf32>
    %c8 = arith.constant 8 : index
    %c0_18 = arith.constant 0 : index
    %48 = vector.load %arg7[%c8, %c0_18] : memref<36x128xf32, #tpu.memory_space<vmem>>, vector<4x128xf32>
    tpu.vector_store %arg7[%c8, %c0_18], %47 {strides = array<i32>} : memref<36x128xf32, #tpu.memory_space<vmem>>, vector<4x128xf32>,
    %49 = vector.extract_strided_slice %9 {offsets = [0, 127], sizes = [4, 128], strides = [1, 1]} : vector<4x384xf32> to vector<4x128xf32>
    %cst_19 = arith.constant 0.000000e+00 : f32
    %50 = vector.shape_cast %16 : vector<1x128xi1> to vector<1x128xi1>
    %51 = vector.broadcast %50 : vector<1x128xi1> to vector<4x128xi1>
    %52 = vector.broadcast %cst_19 : f32 to vector<4x128xf32>
    %53 = arith.select %51, %49, %52 : vector<4x128xi1>, vector<4x128xf32>
    %c12 = arith.constant 12 : index
    %c0_20 = arith.constant 0 : index
    %54 = vector.load %arg7[%c12, %c0_20] : memref<36x128xf32, #tpu.memory_space<vmem>>, vector<4x128xf32>
    tpu.vector_store %arg7[%c12, %c0_20], %53 {strides = array<i32>} : memref<36x128xf32, #tpu.memory_space<vmem>>, vector<4x128xf32>,
    %55 = vector.extract_strided_slice %9 {offsets = [0, 128], sizes = [4, 128], strides = [1, 1]} : vector<4x384xf32> to vector<4x128xf32>
    %c16 = arith.constant 16 : index
    %c0_21 = arith.constant 0 : index
    %56 = vector.load %arg7[%c16, %c0_21] : memref<36x128xf32, #tpu.memory_space<vmem>>, vector<4x128xf32>
    tpu.vector_store %arg7[%c16, %c0_21], %55 {strides = array<i32>} : memref<36x128xf32, #tpu.memory_space<vmem>>, vector<4x128xf32>,
    %57 = vector.extract_strided_slice %9 {offsets = [0, 129], sizes = [4, 128], strides = [1, 1]} : vector<4x384xf32> to vector<4x128xf32>
    %cst_22 = arith.constant 0.000000e+00 : f32
    %58 = vector.shape_cast %18 : vector<1x128xi1> to vector<1x128xi1>
    %59 = vector.broadcast %58 : vector<1x128xi1> to vector<4x128xi1>
    %60 = vector.broadcast %cst_22 : f32 to vector<4x128xf32>
    %61 = arith.select %59, %57, %60 : vector<4x128xi1>, vector<4x128xf32>
    %c20 = arith.constant 20 : index
    %c0_23 = arith.constant 0 : index
    %62 = vector.load %arg7[%c20, %c0_23] : memref<36x128xf32, #tpu.memory_space<vmem>>, vector<4x128xf32>
    tpu.vector_store %arg7[%c20, %c0_23], %61 {strides = array<i32>} : memref<36x128xf32, #tpu.memory_space<vmem>>, vector<4x128xf32>,
    %63 = vector.extract_strided_slice %9 {offsets = [0, 143], sizes = [4, 128], strides = [1, 1]} : vector<4x384xf32> to vector<4x128xf32>
    %64 = arith.andi %28, %16 : vector<1x128xi1>
    %cst_24 = arith.constant 0.000000e+00 : f32
    %65 = vector.shape_cast %64 : vector<1x128xi1> to vector<1x128xi1>
    %66 = vector.broadcast %65 : vector<1x128xi1> to vector<4x128xi1>
    %67 = vector.broadcast %cst_24 : f32 to vector<4x128xf32>
    %68 = arith.select %66, %63, %67 : vector<4x128xi1>, vector<4x128xf32>
    %c24 = arith.constant 24 : index
    %c0_25 = arith.constant 0 : index
    %69 = vector.load %arg7[%c24, %c0_25] : memref<36x128xf32, #tpu.memory_space<vmem>>, vector<4x128xf32>
    tpu.vector_store %arg7[%c24, %c0_25], %68 {strides = array<i32>} : memref<36x128xf32, #tpu.memory_space<vmem>>, vector<4x128xf32>,
    %70 = vector.extract_strided_slice %9 {offsets = [0, 144], sizes = [4, 128], strides = [1, 1]} : vector<4x384xf32> to vector<4x128xf32>
    %cst_26 = arith.constant 0.000000e+00 : f32
    %71 = vector.shape_cast %28 : vector<1x128xi1> to vector<1x128xi1>
    %72 = vector.broadcast %71 : vector<1x128xi1> to vector<4x128xi1>
    %73 = vector.broadcast %cst_26 : f32 to vector<4x128xf32>
    %74 = arith.select %72, %70, %73 : vector<4x128xi1>, vector<4x128xf32>
    %c28 = arith.constant 28 : index
    %c0_27 = arith.constant 0 : index
    %75 = vector.load %arg7[%c28, %c0_27] : memref<36x128xf32, #tpu.memory_space<vmem>>, vector<4x128xf32>
    tpu.vector_store %arg7[%c28, %c0_27], %74 {strides = array<i32>} : memref<36x128xf32, #tpu.memory_space<vmem>>, vector<4x128xf32>,
    %76 = vector.extract_strided_slice %9 {offsets = [0, 145], sizes = [4, 128], strides = [1, 1]} : vector<4x384xf32> to vector<4x128xf32>
    %77 = arith.andi %28, %18 : vector<1x128xi1>
    %cst_28 = arith.constant 0.000000e+00 : f32
    %78 = vector.shape_cast %77 : vector<1x128xi1> to vector<1x128xi1>
    %79 = vector.broadcast %78 : vector<1x128xi1> to vector<4x128xi1>
    %80 = vector.broadcast %cst_28 : f32 to vector<4x128xf32>
    %81 = arith.select %79, %76, %80 : vector<4x128xi1>, vector<4x128xf32>
    %c32 = arith.constant 32 : index
    %c0_29 = arith.constant 0 : index
    %82 = vector.load %arg7[%c32, %c0_29] : memref<36x128xf32, #tpu.memory_space<vmem>>, vector<4x128xf32>
    tpu.vector_store %arg7[%c32, %c0_29], %81 {strides = array<i32>} : memref<36x128xf32, #tpu.memory_space<vmem>>, vector<4x128xf32>,
    %c0_30 = arith.constant 0 : index
    %c0_31 = arith.constant 0 : index
    %83 = vector.load %arg5[%c0_30, %c0_31] : memref<8x36xf32, #tpu.memory_space<vmem>>, vector<8x36xf32>
    %c0_32 = arith.constant 0 : index
    %c0_33 = arith.constant 0 : index
    %84 = vector.load %arg7[%c0_32, %c0_33] : memref<36x128xf32, #tpu.memory_space<vmem>>, vector<36x128xf32>
    %cst_34 = arith.constant dense<0.000000e+00> : vector<8x128xf32>
    %85 = tpu.matmul %83, %84, %cst_34 {dimension_numbers = #tpu.dot_dimension_numbers<[1], [0], [0], [1], [0, 0, 1, 1], [], []>} : vector<8x36xf32>, vector<36x128xf32>, vector<8x128xf32> -> vector<8x128xf32>
    %cst_35 = arith.constant dense<0.000000e+00> : vector<8xf32>
    %86 = vector.multi_reduction <add>, %85, %cst_35 [1] : vector<8x128xf32> to vector<8xf32>
    %87 = vector.shape_cast %86 : vector<8xf32> to vector<8x1xf32>
    %cst_36 = arith.constant 7.812500e-03 : f32
    %88 = vector.broadcast %cst_36 : f32 to vector<8x1xf32>
    %89 = arith.mulf %87, %88 : vector<8x1xf32>
    %90 = vector.broadcast %89 : vector<8x1xf32> to vector<8x128xf32>
    %91 = arith.subf %85, %90 : vector<8x128xf32>
    %92 = arith.mulf %91, %91 : vector<8x128xf32>
    %cst_37 = arith.constant dense<0.000000e+00> : vector<8xf32>
    %93 = vector.multi_reduction <add>, %92, %cst_37 [1] : vector<8x128xf32> to vector<8xf32>
    %94 = vector.shape_cast %93 : vector<8xf32> to vector<8x1xf32>
    %95 = arith.mulf %89, %89 : vector<8x1xf32>
    %cst_38 = arith.constant 1.280000e+02 : f32
    %96 = vector.broadcast %cst_38 : f32 to vector<8x1xf32>
    %97 = arith.mulf %95, %96 : vector<8x1xf32>
    %c0_39 = arith.constant 0 : index
    %c0_40 = arith.constant 0 : index
    %c0_41 = arith.constant 0 : index
    %98 = vector.load %arg6[%c0_39, %c0_40, %c0_41] : memref<1x8x3xf32, #tpu.memory_space<vmem>>, vector<1x8x1xf32>
    %99 = vector.shape_cast %98 : vector<1x8x1xf32> to vector<8x1xf32>
    %100 = arith.addf %99, %87 : vector<8x1xf32>
    %c0_42 = arith.constant 0 : index
    %c0_43 = arith.constant 0 : index
    %c0_44 = arith.constant 0 : index
    %101 = vector.load %arg6[%c0_42, %c0_43, %c0_44] : memref<1x8x3xf32, #tpu.memory_space<vmem>>, vector<1x8x1xf32>
    %102 = vector.shape_cast %101 : vector<1x8x1xf32> to vector<8x1xf32>
    %103 = vector.shape_cast %100 : vector<8x1xf32> to vector<1x8x1xf32>
    tpu.vector_store %arg6[%c0_42, %c0_43, %c0_44], %103 {strides = array<i32>} : memref<1x8x3xf32, #tpu.memory_space<vmem>>, vector<1x8x1xf32>,
    %c0_45 = arith.constant 0 : index
    %c0_46 = arith.constant 0 : index
    %c1 = arith.constant 1 : index
    %104 = vector.load %arg6[%c0_45, %c0_46, %c1] : memref<1x8x3xf32, #tpu.memory_space<vmem>>, vector<1x8x1xf32>
    %105 = vector.shape_cast %104 : vector<1x8x1xf32> to vector<8x1xf32>
    %106 = arith.addf %105, %94 : vector<8x1xf32>
    %c0_47 = arith.constant 0 : index
    %c0_48 = arith.constant 0 : index
    %c1_49 = arith.constant 1 : index
    %107 = vector.load %arg6[%c0_47, %c0_48, %c1_49] : memref<1x8x3xf32, #tpu.memory_space<vmem>>, vector<1x8x1xf32>
    %108 = vector.shape_cast %107 : vector<1x8x1xf32> to vector<8x1xf32>
    %109 = vector.shape_cast %106 : vector<8x1xf32> to vector<1x8x1xf32>
    tpu.vector_store %arg6[%c0_47, %c0_48, %c1_49], %109 {strides = array<i32>} : memref<1x8x3xf32, #tpu.memory_space<vmem>>, vector<1x8x1xf32>,
    %c0_50 = arith.constant 0 : index
    %c0_51 = arith.constant 0 : index
    %c2 = arith.constant 2 : index
    %110 = vector.load %arg6[%c0_50, %c0_51, %c2] : memref<1x8x3xf32, #tpu.memory_space<vmem>>, vector<1x8x1xf32>
    %111 = vector.shape_cast %110 : vector<1x8x1xf32> to vector<8x1xf32>
    %112 = arith.addf %111, %97 : vector<8x1xf32>
    %c0_52 = arith.constant 0 : index
    %c0_53 = arith.constant 0 : index
    %c2_54 = arith.constant 2 : index
    %113 = vector.load %arg6[%c0_52, %c0_53, %c2_54] : memref<1x8x3xf32, #tpu.memory_space<vmem>>, vector<1x8x1xf32>
    %114 = vector.shape_cast %113 : vector<1x8x1xf32> to vector<8x1xf32>
    %115 = vector.shape_cast %112 : vector<8x1xf32> to vector<1x8x1xf32>
    tpu.vector_store %arg6[%c0_52, %c0_53, %c2_54], %115 {strides = array<i32>} : memref<1x8x3xf32, #tpu.memory_space<vmem>>, vector<1x8x1xf32>,
    return
  }
  func.func @transform_0(%arg0: i32, %arg1: i32) -> (i32, i32, i32) {
    %c0_i32 = arith.constant 0 : i32
    %c0_i32_0 = arith.constant 0 : i32
    return %arg0, %c0_i32, %arg1 : i32, i32, i32
  }
  func.func @transform_1(%arg0: i32, %arg1: i32) -> (i32, i32, i32) {
    %c1_i32 = arith.constant 1 : i32
    %0 = arith.muli %arg1, %c1_i32 : i32
    %c1_i32_0 = arith.constant 1 : i32
    %1 = arith.subi %0, %c1_i32_0 : i32
    %c0_i32 = arith.constant 0 : i32
    %2 = arith.maxsi %1, %c0_i32 : i32
    %c0_i32_1 = arith.constant 0 : i32
    %c0_i32_2 = arith.constant 0 : i32
    return %arg0, %c0_i32_1, %2 : i32, i32, i32
  }
  func.func @transform_2(%arg0: i32, %arg1: i32) -> (i32, i32, i32) {
    %c1_i32 = arith.constant 1 : i32
    %0 = arith.addi %arg1, %c1_i32 : i32
    %c1_i32_0 = arith.constant 1 : i32
    %1 = arith.muli %0, %c1_i32_0 : i32
    %c1_i32_1 = arith.constant 1 : i32
    %2 = arith.minsi %1, %c1_i32_1 : i32
    %c0_i32 = arith.constant 0 : i32
    %c0_i32_2 = arith.constant 0 : i32
    return %arg0, %c0_i32, %2 : i32, i32, i32
  }
  func.func @transform_3(%arg0: i32, %arg1: i32) -> (i32, i32) {
    %c0_i32 = arith.constant 0 : i32
    %c0_i32_0 = arith.constant 0 : i32
    %c0_i32_1 = arith.constant 0 : i32
    return %c0_i32, %c0_i32_0 : i32, i32
  }
  func.func @transform_4(%arg0: i32, %arg1: i32) -> (i32, i32, i32) {
    %c0_i32 = arith.constant 0 : i32
    %c0_i32_0 = arith.constant 0 : i32
    %c0_i32_1 = arith.constant 0 : i32
    return %arg0, %c0_i32, %c0_i32_0 : i32, i32, i32
  }
}

</mosaic_0001>

<bundles_post_ra>
// kernel: tpu_custom_call.1
= control target key start
LH: loop header
LB: loop body
LE: loop exit
PB: predicated region body
PF: predicated region fallthrough
CT: control target
= control target key end

     0   :  { %s1569_s0 = inlined_call_operand.hbm [shape: f32[2,4,256], index: 0, kind: input, shape index: {}]   ;;  %s1570_s1 = inlined_call_operand.hbm [shape: f32[2,4,256], index: 1, kind: input, shape index: {}]   ;;  %s1571_s2 = inlined_call_operand.hbm [shape: f32[2,4,256], index: 2, kind: input, shape index: {}]   ;;  %s1572_s3 = inlined_call_operand.vmem [shape: f32[8,36], index: 3, kind: input, shape index: {}]   ;;  %s1573_s4 = inlined_call_operand.vmem [shape: f32[2,8,3], index: 4, kind: output, shape index: {}]  }
   0x1   :  { %1586 = sst [smem:[#allocation15_spill]] %s1569_s0 }
   0x2   :  { %1587 = sst [smem:[#allocation16_spill]] %s1570_s1 }
   0x3   :  { %1588 = sst [smem:[#allocation17_spill]] %s1572_s3 }
   0x4   :  { %1589 = sst [smem:[#allocation18_spill]] %s1573_s4 }
   0x5   :  { %9 = vsyncpa [#allocation4], 0 }
   0x6   :  { %11 = vsyncpa [#allocation4 + $0x1], 0 }
   0x7   :  { %12 = vsyncpa [#allocation6], 0 }
   0x8   :  { %14 = vsyncpa [#allocation6 + $0x1], 0  ;;  %s1133_s15 = smov 0   ;;  %s1135_s16 = smov 0  }
   0x9   :  { %s1137_s17 = smov 0   ;;  %s1139_s18 = smov 0  }
   0xa   :  { %s1141_s19 = smov 0   ;;  %s1143_s20 = smov 0  }
   0xb   :  { %s1145_s21 = smov 0   ;;  %s1147_s22 = smov 0  }
   0xc   :  { %s1149_s23 = smov 0   ;;  %s1151_s24 = smov 0  }
   0xd   :  { %s1153_s25 = smov 0   ;;  %s1155_s26 = smov 0  }
   0xe   :  { %s1157_s27 = smov 0   ;;  %s1159_s28 = smov 0  }
   0xf LB: > { %1590 = sst [smem:[#allocation11_spill]] %s1075_s24  ;;  %s1574_s29 = sadd.s32 4294967295, %s1091_s28   ;;  %s1091_s28 = sphi %s1159_s28, %s20_s28   ;;  %s1087_s27 = sphi %s1157_s27, %s1647_s27   ;;  %s1083_s26 = sphi %s1155_s26, %s1646_s26   ;;  %s1079_s25 = sphi %s1153_s25, %s1645_s25   ;;  %s1075_s24 = sphi %s1151_s24, %s1644_s24   ;;  %s1071_s23 = sphi %s1149_s23, %s1643_s23   ;;  %s1067_s22 = sphi %s1147_s22, %s1642_s22   ;;  %s1063_s21 = sphi %s1145_s21, %s1641_s21   ;;  %s1059_s20 = sphi %s1143_s20, %s1640_s20   ;;  %s1055_s19 = sphi %s1141_s19, %s1639_s19   ;;  %s1051_s18 = sphi %s1139_s18, %s1638_s18   ;;  %s1047_s17 = sphi %s1137_s17, %s1637_s17   ;;  %s1043_s16 = sphi %s1135_s16, %s1636_s16   ;;  %s1039_s15 = sphi %s1133_s15, %s1635_s15  }
  0x10   : > { %1591 = sst [smem:[#allocation12_spill]] %s1079_s25  ;;  %s29_s30 = sadd.s32 1, %s1083_s26 }
  0x11   : > { %p30_p0 = scmp.ge.s32.totalorder %s29_s30, 2  ;;  %s32_s5 = sadd.s32 1, %s1087_s27 }
  0x12   : > { %p1583_p1 = scmp.eq.s32.totalorder %s1091_s28, 0  ;;  %p1207_p2 = scmp.eq.s32.totalorder %s1574_s29, 0 }
  0x13   : > { %s1649_s30 = smov (%p30_p0, %s29_s30), 0  ;;  %s1651_s5 = smov (!%p30_p0, %s32_s5), %s1087_s27 }
  0x14   : > { %1593 = sst [smem:[#allocation13_spill]] %s1649_s30  ;;  %s37_s7 = ssub.s32 %s1083_s26, %s1649_s30 }
  0x15   : > { %p34_p3 = scmp.ge.s32.totalorder %s1651_s5, 2  ;;  %s75_s8 = sadd.s32 1, %s1059_s20 }
  0x16   : > { %p82_p4 = scmp.ne.s32.totalorder %s1059_s20, %s1055_s19  ;;  %p88_p6 = scmp.ne.s32.totalorder %s1055_s19, %s1051_s18 }
  0x17   : > { %s1653_s5 = smov (%p34_p3, %s1651_s5), 0  ;;  %p1582_p9 = scmp.lt.s32.totalorder %s1091_s28, 4 }
  0x18   : > { %1594 = sst [smem:[#allocation14_spill]] %s1653_s5  ;;  %s1221_s9 = ssub.s32 %s1087_s27, %s1653_s5 }
  0x19   : > { %s1224_s10 = sor.u32 %s37_s7, %s1221_s9  ;;  %p1232_p7 = por %p82_p4, %p1583_p1 }
  0x1a   : > { %p1238_p8 = por %p88_p6, %p1207_p2  ;;  %p1581_p10 = scmp.eq.s32.totalorder %s1221_s9, 0 }
  0x1b   : > { %s690_s13 = sshll.u32 %s1087_s27, 1  ;;  %s216_s14 = sand.u32 1, %s1091_s28  }
  0x1c   : > { %s1596_s12 = scalar_select %p1238_p8, 1, 0 }
  0x1d   : > { %s218_s7 = sand.u32 1, %s1059_s20   ;;  %s1580_s5 = sshll.u32 %s1087_s27, 7 }
  0x1e   : > { %s1250_s18 = scalar_select %p1581_p10, %s1059_s20, %s75_s8  }
  0x1f   : > { %s692_s29 = sshll.u32 %s218_s7, 2  ;;  %s1597_s1 = sld [smem:[#allocation16_spill]] }
  0x20   : > { %s220_s30 = scalar_lea.vmem [#allocation5], %s692_s29  ;;  %p1266_p11 = pnand %p1582_p9, %p1232_p7 }
  0x21   : > { %s232_s3 = sshll.u32 %s220_s30, 4  ;;  %s1272_s29 = scalar_lea.sflag [#allocation6], %s216_s14  ;;  %s1260_s3 = int_to_ptr.vmem [resolvable:$true] %s232_s3 }
  0x22   : > { %p877_p3 = pneg %p1266_p11 }
  0x25   : > { %s1258_s25 = scalar_lea.hbm %s1597_s1, %s1580_s5  ;;  %s880_s11 = scalar_lea.hbm %s1597_s1, 256 }
  0x26   : > { %s875_s4 = scalar_lea.hbm %s1258_s25, 64  ;;  %p881_p7 = scmp.lt.u32.totalorder %s1258_s25, %s1597_s1 }
  0x27   : > { %p876_p0 = scmp.ne.s32.totalorder %s1258_s25, %s875_s4  ;;  %p882_p10 = scmp.lt.u32.totalorder %s880_s11, %s875_s4 }
  0x28   : > { %p884_p1 = scmp.lt.u32.totalorder %s875_s4, %s1258_s25 }
  0x29   : > { %p878_p4 = pnand %p877_p3, %p876_p0  ;;  %p883_p9 = por %p882_p10, %p881_p7 }
  0x2b   : > { %p879_p6 = pneg %p878_p4  ;;  %p885_p5 = por %p884_p1, %p883_p9 }
  0x2d   : > { %p886_p12 = pnand %p885_p5, %p879_p6 }
  0x2f   : > { %889 = shalt.err (!%p886_p12)
}
  0x30   : > { %s890_s14 = scalar_lea.vmem %s1260_s3, 64  ;;  %s1093_s24 = smov [#allocation5]  }
  0x31   : > { %p891_p0 = scmp.ne.s32.totalorder %s1260_s3, %s890_s14  ;;  %s895_s30 = sshll.u32 %s1093_s24, 4  ;;  %s896_s30 = int_to_ptr.vmem [resolvable:$false] %s895_s30 }
  0x32   : > { %s897_s5 = scalar_lea.vmem %s896_s30, 128  ;;  %p898_p8 = scmp.lt.s32.totalorder %s1260_s3, %s896_s30 }
  0x33   : > { %p893_p4 = pnand %p891_p0, %p877_p3  ;;  %p899_p10 = scmp.lt.s32.totalorder %s897_s5, %s890_s14 }
  0x35   : > { %p894_p13 = pneg %p893_p4  ;;  %p900_p7 = por %p899_p10, %p898_p8 }
  0x37   : > { %p901_p1 = pnand %p900_p7, %p894_p13 }
  0x39   : > { %904 = shalt.err (!%p901_p1)
}
  0x3a   : > { %746 = dma.hbm_to_vmem [thread:$0]  (!%p1266_p11), %s1258_s25, 64, %s1260_s3, %s1272_s29  }
  0x3b   : > { %p1599_p5 = scmp.lt.s32.totalorder %s1091_s28, 5  ;;  %p1600_p8 = scmp.ge.s32.totalorder %s1091_s28, 1 }
  0x3c   : > { %s41_s4 = sadd.s32 1, %s1071_s23  ;;  %p1602_p12 = scmp.eq.s32.totalorder %s1224_s10, 0 }
  0x3d   : > { %p1304_p9 = pnand %p1600_p8, %p1599_p5  ;;  %p48_p13 = scmp.ne.s32.totalorder %s1071_s23, %s1067_s22 }
  0x3e   : > { %s1312_s11 = scalar_select %p1602_p12, %s1071_s23, %s41_s4  }
  0x3f   : > { %s1601_s8 = scalar_select %p1304_p9, 1, 0 }
  0x40   : > { %p54_p3 = scmp.ne.s32.totalorder %s1067_s22, %s1063_s21  ;;  %s196_s7 = sand.u32 1, %s1071_s23  }
  0x41   : > { %s205_s14 = sadd.s32 %s1083_s26, %s690_s13  ;;  %p1603_p6 = scmp.eq.s32.totalorder %s1091_s28, 0 }
  0x42   : > { %p1326_p11 = por %p1207_p2, %p54_p3  ;;  %s689_s25 = sshll.u32 %s196_s7, 2 }
  0x43   : > { %p50_p0 = por %p1603_p6, %p48_p13  ;;  %s691_s24 = sshll.u32 %s205_s14, 6 }
  0x44   : > { %s1604_s3 = scalar_select %p1326_p11, 1, 0 }
  0x45   : > { %s1605_s0 = sld [smem:[#allocation15_spill]]  ;;  %s200_s21 = scalar_lea.vmem [#allocation3], %s689_s25 }
  0x46   : > { %s209_s13 = sshll.u32 %s200_s21, 4  ;;  %p1606_p4 = scmp.lt.s32.totalorder %s1091_s28, 4  ;;  %s1335_s13 = int_to_ptr.vmem [resolvable:$true] %s209_s13 }
  0x47   : > { %s197_s14 = scalar_lea.sflag [#allocation4], %s196_s7 }
  0x48   : > { %p1339_p10 = pnand %p1606_p4, %p50_p0 }
  0x4a   : > { %p907_p1 = pneg %p1339_p10 }
  0x4b   : > { %s1333_s10 = scalar_lea.hbm %s1605_s0, %s691_s24  ;;  %s910_s30 = scalar_lea.hbm %s1605_s0, 256 }
  0x4c   : > { %s905_s1 = scalar_lea.hbm %s1333_s10, 64  ;;  %p911_p12 = scmp.lt.u32.totalorder %s1333_s10, %s1605_s0 }
  0x4d   : > { %p906_p7 = scmp.ne.s32.totalorder %s1333_s10, %s905_s1  ;;  %p912_p13 = scmp.lt.u32.totalorder %s910_s30, %s905_s1 }
  0x4e   : > { %p914_p6 = scmp.lt.u32.totalorder %s905_s1, %s1333_s10 }
  0x4f   : > { %p908_p5 = pnand %p907_p1, %p906_p7  ;;  %p913_p3 = por %p912_p13, %p911_p12 }
  0x51   : > { %p909_p8 = pneg %p908_p5  ;;  %p915_p0 = por %p914_p6, %p913_p3 }
  0x53   : > { %p916_p4 = pnand %p915_p0, %p909_p8 }
  0x55   : > { %919 = shalt.err (!%p916_p4)
}
  0x56   : > { %s920_s7 = scalar_lea.vmem %s1335_s13, 64  ;;  %s1094_s25 = smov [#allocation3]  }
  0x57   : > { %p921_p7 = scmp.ne.s32.totalorder %s1335_s13, %s920_s7  ;;  %s925_s24 = sshll.u32 %s1094_s25, 4  ;;  %s926_s24 = int_to_ptr.vmem [resolvable:$false] %s925_s24 }
  0x58   : > { %s927_s5 = scalar_lea.vmem %s926_s24, 128  ;;  %p928_p9 = scmp.lt.s32.totalorder %s1335_s13, %s926_s24 }
  0x59   : > { %p923_p5 = pnand %p921_p7, %p907_p1  ;;  %p929_p12 = scmp.lt.s32.totalorder %s927_s5, %s920_s7 }
  0x5b   : > { %p924_p11 = pneg %p923_p5  ;;  %p930_p13 = por %p929_p12, %p928_p9 }
  0x5d   : > { %p931_p3 = pnand %p930_p13, %p924_p11 }
  0x5f   : > { %934 = shalt.err (!%p931_p3)
}
  0x60   : > { %743 = dma.hbm_to_vmem [thread:$0]  (!%p1339_p10), %s1333_s10, 64, %s1335_s13, %s197_s14  }
  0x61   : > { %s109_s1 = sadd.s32 1, %s1047_s17  ;;  %p116_p9 = scmp.ne.s32.totalorder %s1047_s17, %s1043_s16 }
  0x62   : > { %p122_p11 = scmp.ne.s32.totalorder %s1043_s16, %s1039_s15  ;;  %s241_s30 = sand.u32 1, %s1047_s17  }
  0x63   : > { %p1608_p1 = scmp.eq.s32.totalorder %s1091_s28, 0  ;;  %s696_s21 = sshll.u32 %s241_s30, 2 }
  0x64   : > { %p1378_p6 = por %p122_p11, %p1207_p2  ;;  %s1610_s7 = sshll.u32 %s1087_s27, 7 }
  0x65   : > { %p118_p8 = por %p116_p9, %p1608_p1  ;;  %s1035_s25 = sadd.s32 64, %s1610_s7 }
  0x66   : > { %s243_s24 = scalar_lea.vmem [#allocation7], %s696_s21  ;;  %p1611_p0 = scmp.eq.s32.totalorder %s1221_s9, 0 }
  0x67   : > { %s255_s5 = sshll.u32 %s243_s24, 4  ;;  %s1392_s15 = scalar_lea.hbm %s1571_s2, %s1035_s25  ;;  %s1394_s5 = int_to_ptr.vmem [resolvable:$true] %s255_s5 }
  0x68   : > { %s1387_s0 = scalar_select %p1611_p0, %s1047_s17, %s109_s1  }
  0x69   : > { %p1612_p2 = scmp.lt.s32.totalorder %s1091_s28, 4  ;;  %s935_s9 = scalar_lea.hbm %s1392_s15, 64 }
  0x6a   : > { %p936_p4 = scmp.ne.s32.totalorder %s1392_s15, %s935_s9  ;;  %s940_s30 = scalar_lea.hbm %s1571_s2, 256 }
  0x6b   : > { %p1398_p10 = pnand %p1612_p2, %p118_p8  ;;  %p941_p13 = scmp.lt.u32.totalorder %s1392_s15, %s1571_s2 }
  0x6c   : > { %p942_p3 = scmp.lt.u32.totalorder %s940_s30, %s935_s9  ;;  %p944_p11 = scmp.lt.u32.totalorder %s935_s9, %s1392_s15 }
  0x6d   : > { %p937_p7 = pneg %p1398_p10 }
  0x6e   : > { %p943_p9 = por %p942_p3, %p941_p13 }
  0x6f   : > { %p938_p5 = pnand %p937_p7, %p936_p4 }
  0x70   : > { %p945_p1 = por %p944_p11, %p943_p9 }
  0x71   : > { %p939_p12 = pneg %p938_p5 }
  0x73   : > { %p946_p8 = pnand %p945_p1, %p939_p12 }
  0x75   : > { %949 = shalt.err (!%p946_p8)
}
  0x76   : > { %s950_s25 = scalar_lea.vmem %s1394_s5, 64  ;;  %s1095_s24 = smov [#allocation7]  }
  0x77   : > { %p951_p0 = scmp.ne.s32.totalorder %s1394_s5, %s950_s25  ;;  %s955_s10 = sshll.u32 %s1095_s24, 4  ;;  %s956_s10 = int_to_ptr.vmem [resolvable:$false] %s955_s10 }
  0x78   : > { %s957_s13 = scalar_lea.vmem %s956_s10, 128  ;;  %p958_p5 = scmp.lt.s32.totalorder %s1394_s5, %s956_s10 }
  0x79   : > { %p953_p2 = pnand %p951_p0, %p937_p7  ;;  %p959_p13 = scmp.lt.s32.totalorder %s957_s13, %s950_s25 }
  0x7b   : > { %p954_p4 = pneg %p953_p2  ;;  %p960_p3 = por %p959_p13, %p958_p5 }
  0x7d   : > { %p961_p9 = pnand %p960_p3, %p954_p4 }
  0x7f   : > { %964 = shalt.err (!%p961_p9)
}
  0x80   : > { %749 = dma.hbm_to_vmem [thread:$0]  (!%p1398_p10), %s1392_s15, 64, %s1394_s5, %s1272_s29  }
  0x81   : > { %p1614_p12 = scmp.ne.s32.totalorder %s1601_s8, 0 }
  0x82   : > { %s266_s9 = sand.u32 (!%p1614_p12), 1, %s1067_s22   ;;  %p1615_p7 = scmp.ne.s32.totalorder (!%p1614_p12), %s1604_s3, 0 }
  0x83   : > { %264 = sbr.rel (%p1614_p12) target bundleno = 837 (0x345), region = 36  ;;  %s700_s14 = sshll.u32 (!%p1614_p12), %s266_s9, 2 }
  0x84   : > { %s267_s1 = scalar_lea.sflag (!%p1614_p12), [#allocation4], %s266_s9  ;;  %s270_s30 = scalar_lea.vmem (!%p1614_p12), [#allocation3], %s700_s14 }
  0x8a   : > { %1022 = dma.done.wait (%p1615_p7), %s267_s1, 64  }
  0x8b   : > { %1024 = vsyncadd (%p1615_p7), %s267_s1, 4294967232  ;;  %s1616_s6 = sadd.s32 4294967295, %s1091_s28   ;;  %s277_s29 = sand.u32 1, %s1055_s19  }
  0x8c   : > { %s275_s21 = sand.u32 1, %s1616_s6   ;;  %s701_s5 = sshll.u32 %s277_s29, 2 }
  0x8d   : > { %s276_s8 = scalar_lea.sflag [#allocation6], %s275_s21  ;;  %s279_s15 = scalar_lea.vmem [#allocation5], %s701_s5 }
  0x8e   : > { %p1617_p10 = scmp.ne.s32.totalorder %s1596_s12, 0 }
  0x90   : > { %1026 = dma.done.wait (%p1617_p10), %s276_s8, 64  }
  0x91   : > { %1028 = vsyncadd (%p1617_p10), %s276_s8, 4294967232  ;;  %s286_s7 = sand.u32 1, %s1043_s16  }
  0x92   : > { %s1443_s25 = sshll.u32 %s286_s7, 2 }
  0x93   : > { %s288_s3 = scalar_lea.vmem [#allocation7], %s1443_s25 }
  0x94   : > { %1030 = dma.done.wait (%p1378_p6), %s276_s8, 64  }
  0x95   : > { %1032 = vsyncadd (%p1378_p6), %s276_s8, 4294967232  ;;  %s1618_s24 = sld [smem:[#allocation12_spill]]  ;;  %s1619_s9 = sld [smem:[#allocation18_spill]] }
  0x96   : > { %s1620_s1 = sld [smem:[#allocation11_spill]] }
  0x9b   : > { %p328_p11 = scmp.lt.s32.totalorder %s1618_s24, 1 }
  0x9c   : > { %p704_p1 = scmp.ne.s32.totalorder %s1620_s1, 0 }
  0x9d   : > { %s1655_s24 = smov (!%p328_p11, %s1618_s24), 1  ;;  %vm336_vm0 = vcmask (!%p704_p1), 23552   ;;  %v1096_v0 = vmov (!%p704_p1), 0.0  }
  0x9e   : > { %s703_s10 = sshll.u32 %s1655_s24, 3  ;;  %335 = sbr.rel (%p704_p1) target bundleno = 165 (0xa5), region = 52 }
  0x9f   : > { %s1455_s14 = scalar_lea.vmem %s1619_s9, %s703_s10 }
  0xa0   : > { %337 = vst.msk [vmem:[%s1455_s14] sm:$0xff] (!%p704_p1), %vm336_vm0, %v1096_v0 }
  0xa5 PF: > { %v339_v1 = vld [vmem:[%s279_s15] sm:$0xf]  ;;  %v338_v2 = vld [vmem:[%s270_s30] sm:$0xf]  ;;  %s1097_s4 = smov 16   ;;  %s1098_s6 = smov 17   ;;  %v341_v6 = vlaneseq }
  0xa6   : > { %374 = vrot.lane.b32.xlu1 %v339_v1, %s1097_s4  ;;  %363 = vrot.lane.b32.xlu0 %v339_v1, %s1098_s6  ;;  %406 = vst [vmem:[#allocation2 + $0x10] sm:$0xf] %v338_v2  ;;  %s1099_s21 = smov 15   ;;  %v1100_v3 = vmov 0.0|0.0   ;;  %s1101_s29 = smov 1   ;;  %vm1105_vm1 = vmmov 0  }
  0xa7   : > { %728 = vmatprep.subr.bf16.mxu0 %v1100_v3  ;;  %v340_v4 = vld [vmem:[%s288_s3] sm:$0xf]  ;;  %s1102_s30 = smov 127   ;;  %s1621_s5 = sld [smem:[#allocation11_spill]]  ;;  %v1106_v5 = vmov 0.0   ;;  %v342_v7 = vand.u32 127, %v341_v6 }
  0xa8   : > { %s1103_s8 = smov 113   ;;  %s1104_s15 = smov 112   ;;  %725 = vmatprep.mubr.msk.f32.mxu0 %vm1105_vm1, %v1106_v5  ;;  %vm378_vm6 = vcmask 130048   ;;  %vm367_vm7 = vcmask 138240   ;;  %vm390_vm10 = vcmask 121856   ;;  %vm401_vm12 = vcmask 7168  }
  0xa9   : > { %s1107_s7 = smov 111   ;;  %v343_v9 = vand.u32 15, %v342_v7  ;;  %vm347_vm2 = vcmp.ge.s32.totalorder %v342_v7, 16  ;;  %vm353_vm13 = vcmp.lt.s32.totalorder %v342_v7, 112  ;;  %vm414_vm15 = vcmask 1039360   ;;  %s1630_s13 = sld [smem:[#allocation17_spill]] }
  0xaa   : > { %376 = vrot.lane.b32.xlu1 %v338_v2, %s1097_s4  ;;  %365 = vrot.lane.b32.xlu0 %v338_v2, %s1098_s6  ;;  %s348_s25 = scalar_select %p704_p1, 1, 0  ;;  %vm426_vm1 = vcmask 924672   ;;  %v547_v57 = vld [vmem:[%s1455_s14] sm:$0xff] }
  0xab   : > { %vm1471_vm5 = vcmp.gt.s32.totalorder %v343_v9, 0  ;;  %vm1480_vm9 = vcmp.lt.s32.totalorder %v343_v9, 15 }
  0xac   : > { %v349_v8 = vstv %s348_s25 }
  0xad   : > { %vm350_vm3 = vcmp.eq.s32.totalorder %v349_v8, 1  ;;  %p352_p6 = scmp.ne.s32.totalorder %s1621_s5, 1 }
  0xae   : > { %388 = vrot.lane.b32.xlu1 %v338_v2, %s1099_s21  ;;  %386 = vrot.lane.b32.xlu0 %v339_v1, %s1099_s21  ;;  %vm1467_vm4 = vmor %vm350_vm3, %vm347_vm2  ;;  %vm437_vm3 = vcmask 916480  }
  0xaf   : > { %vm358_vm8 = vmand %vm1467_vm4, %vm1471_vm5  ;;  %s354_s3 = scalar_select %p352_p6, 1, 0  ;;  %v454_v54 = vld [vmem:[%s1630_s13] sm:$0xff] }
  0xb0   : > { %vm383_vm11 = vmand %vm1467_vm4, %vm1480_vm9 }
  0xb1   : > { %v355_v25 = vstv %s354_s3 }
  0xb2   : > { %399 = vrot.lane.b32.xlu1 %v338_v2, %s1101_s29  ;;  %397 = vrot.lane.b32.xlu0 %v339_v1, %s1101_s29  ;;  %vm356_vm14 = vcmp.eq.s32.totalorder %v355_v25, 1 }
  0xb3   : > { %vm1493_vm0 = vmor %vm356_vm14, %vm353_vm13 }
  0xb4   : > { %vm419_vm2 = vmand %vm1493_vm0, %vm1471_vm5 }
  0xb6   : > { %412 = vrot.lane.b32.xlu1 %v340_v4, %s1102_s30  ;;  %410 = vrot.lane.b32.xlu0 %v338_v2, %s1102_s30 }
  0xba   : > { %424 = vrot.lane.b32.xlu1 %v340_v4, %s1103_s8  ;;  %422 = vrot.lane.b32.xlu0 %v338_v2, %s1103_s8 }
  0xbe   : > { %435 = vrot.lane.b32.xlu1 %v340_v4, %s1104_s15  ;;  %433 = vrot.lane.b32.xlu0 %v338_v2, %s1104_s15 }
  0xc2   : > { %447 = vrot.lane.b32.xlu1 %v340_v4, %s1107_s7  ;;  %445 = vrot.lane.b32.xlu0 %v338_v2, %s1107_s7 }
 0x118   : > { %v375_v10 = vpop.permute.xlu1 %374  ;;  %v364_v11 = vpop.permute.xlu0 %363 }
 0x11c   : > { %v377_v14 = vpop.permute.xlu1 %376  ;;  %v366_v15 = vpop.permute.xlu0 %365 }
 0x11d   : > { %v379_v17 = vsel %vm378_vm6, %v375_v10, %v377_v14  ;;  %v368_v18 = vsel %vm367_vm7, %v364_v11, %v366_v15  ;;  %vm464_vm6 = vcmask 1043456   ;;  %vm460_vm7 = vcmask 293888  }
 0x11e   : > { %v381_v19 = vsel %vm1467_vm4, %v379_v17, 0.0  ;;  %v370_v20 = vsel %vm358_vm8, %v368_v18, 0.0  ;;  %vm449_vm4 = vcmask 908288   ;;  %vm552_vm8 = vcmask 15368  }
 0x11f   : > { %382 = vst [vmem:[#allocation2 + $0x4] sm:$0xf] %v381_v19  ;;  %371 = vst [vmem:[#allocation2] sm:$0xf] %v370_v20 }
 0x120   : > { %v389_v21 = vpop.permute.xlu1 %388  ;;  %v387_v22 = vpop.permute.xlu0 %386 }
 0x121   : > { %v391_v23 = vsel %vm390_vm10, %v387_v22, %v389_v21 }
 0x122   : > { %v393_v24 = vsel %vm383_vm11, %v391_v23, 0.0 }
 0x123   : > { %394 = vst [vmem:[#allocation2 + $0x8] sm:$0xf] %v393_v24 }
 0x124   : > { %v400_v26 = vpop.permute.xlu1 %399  ;;  %v398_v27 = vpop.permute.xlu0 %397 }
 0x125   : > { %v402_v28 = vsel %vm401_vm12, %v398_v27, %v400_v26 }
 0x126   : > { %v404_v29 = vsel %vm1471_vm5, %v402_v28, 0.0  ;;  %v455_v39 = vld [vmem:[#allocation2] sm:$0xff]  ;;  %vm442_vm5 = vmand %vm1493_vm0, %vm1480_vm9 }
 0x127   : > { %405 = vst [vmem:[#allocation2 + $0xc] sm:$0xf] %v404_v29 }
 0x128   : > { %v413_v30 = vpop.permute.xlu1 %412  ;;  %v411_v31 = vpop.permute.xlu0 %410 }
 0x129   : > { %v415_v33 = vsel %vm414_vm15, %v411_v31, %v413_v30 }
 0x12a   : > { %v417_v34 = vsel %vm1480_vm9, %v415_v33, 0.0  ;;  %vm556_vm9 = vcmask 23568  }
 0x12b   : > { %418 = vst [vmem:[#allocation2 + $0x14] sm:$0xf] %v417_v34 }
 0x12c   : > { %v425_v35 = vpop.permute.xlu1 %424  ;;  %v423_v36 = vpop.permute.xlu0 %422 }
 0x12d   : > { %v427_v37 = vsel %vm426_vm1, %v423_v36, %v425_v35 }
 0x12e   : > { %v429_v38 = vsel %vm419_vm2, %v427_v37, 0.0  ;;  %v456_v40 = vld [vmem:[#allocation2 + $0x8] sm:$0xff] }
 0x12f   : > { %430 = vst [vmem:[#allocation2 + $0x18] sm:$0xf] %v429_v38  ;;  %v729_v41 = vpack.c.bf16 %v456_v40, %v455_v39 }
 0x130   : > { %v436_v42 = vpop.permute.xlu1 %435  ;;  %v434_v43 = vpop.permute.xlu0 %433 }
 0x131   : > { %v438_v44 = vsel %vm437_vm3, %v434_v43, %v436_v42  ;;  %730 = vmatpush3.bf16.msra.mxu0 %v729_v41 }
 0x132   : > { %v440_v45 = vsel %vm1493_vm0, %v438_v44, 0.0  ;;  %731 = vmatprep.subr.bf16.mxu0 %v1100_v3  ;;  %v457_v50 = vld [vmem:[#allocation2 + $0x10] sm:$0xff] }
 0x133   : > { %441 = vst [vmem:[#allocation2 + $0x1c] sm:$0xf] %v440_v45 }
 0x134   : > { %v448_v46 = vpop.permute.xlu1 %447  ;;  %v446_v47 = vpop.permute.xlu0 %445 }
 0x135   : > { %v450_v48 = vsel %vm449_vm4, %v446_v47, %v448_v46 }
 0x136   : > { %v452_v49 = vsel %vm442_vm5, %v450_v48, 0.0 }
 0x137   : > { %453 = vst [vmem:[#allocation2 + $0x20] sm:$0xf] %v452_v49 }
 0x13a   : > { %v458_v51 = vld [vmem:[#allocation2 + $0x18] sm:$0xff] }
 0x13b   : > { %v732_v52 = vpack.c.bf16 %v458_v51, %v457_v50 }
 0x13d   : > { %733 = vmatpush3.bf16.msra.mxu0 %v732_v52 }
 0x13e   : > { %723 = vmatprep.subr.mxu0 %v1106_v5  ;;  %v459_v53 = vld [vmem:[#allocation2 + $0x20] sm:$0xf] }
 0x141   : > { %724 = vmatpush3.msk.msra.mxu0 %vm464_vm6, %v459_v53 }
 0x142   : > { %726 = vmatmul.mubr.msk.f32.vlgmr.msra.gmra.mrb[0].mxu0 %vm460_vm7, %v454_v54 }
 0x215   : > { %v534_v55 = vpop.f32.mrb[0].mxu0 }
 0x216   : > { %538 = vadd.xlane.f32.xlu0 %v534_v55  ;;  %v727_v56 = vpop.f32.mrb[1].mxu0 }
 0x2a3   : > { %v539_v58 = vpop.xlane.xlu0 %538 }
 0x2a4   : > { %v540_v59 = vmul.f32 0.0078125, %v539_v58  ;;  %v548_v60 = vadd.f32 %v547_v57, %v539_v58 }
 0x2a6   : > { %549 = vst.msk [vmem:[%s1455_s14] sm:$0xff] %vm401_vm12, %v548_v60  ;;  %v541_v61 = vsub.f32 %v534_v55, %v540_v59  ;;  %v545_v2 = vmul.f32 %v540_v59, %v540_v59 }
 0x2a8   : > { %v542_v62 = vmul.f32 %v541_v61, %v541_v61  ;;  %v546_v3 = vmul.f32 128.0, %v545_v2 }
 0x2aa   : > { %543 = vadd.xlane.f32.xlu1 %v542_v62 }
 0x2ad   : > { %v550_v0 = vld [vmem:[%s1455_s14] sm:$0xff] }
 0x337   : > { %v544_v63 = vpop.xlane.xlu1 %543 }
 0x338   : > { %v551_v1 = vadd.f32 %v550_v0, %v544_v63 }
 0x33a   : > { %553 = vst.msk [vmem:[%s1455_s14] sm:$0xff] %vm552_vm8, %v551_v1 }
 0x341   : > { %v554_v4 = vld [vmem:[%s1455_s14] sm:$0xff] }
 0x342   : > { %v555_v5 = vadd.f32 %v554_v4, %v546_v3 }
 0x344   : > { %557 = vst.msk [vmem:[%s1455_s14] sm:$0xff] %vm556_vm9, %v555_v5 }
 0x345 PF: > { %s20_s28 = sadd.s32 1, %s1091_s28   ;;  %s1632_s9 = smov %s1250_s18 }
 0x346   : > { %p1522_p8 = scmp.ge.s32.totalorder %s20_s28, 6   ;;  %s1633_s1 = sld [smem:[#allocation13_spill]] }
 0x347   : > { %s1634_s14 = sld [smem:[#allocation14_spill]]  ;;  %s1635_s15 = smov %s1043_s16 }
 0x348   : > { %s1636_s16 = smov %s1047_s17  ;;  %s1637_s17 = smov %s1387_s0 }
 0x349   : > { %s1638_s18 = smov %s1055_s19  ;;  %s1639_s19 = smov %s1059_s20 }
 0x34a   : > { %s1640_s20 = smov %s1632_s9  ;;  %s1641_s21 = smov %s1067_s22 }
 0x34b   : > { %s1642_s22 = smov %s1071_s23  ;;  %s1643_s23 = smov %s1312_s11 }
 0x34c   : > { %s1644_s24 = smov %s1083_s26  ;;  %s1645_s25 = smov %s1087_s27 }
 0x34d   : > { %s1646_s26 = smov %s1633_s1  ;;  %s1647_s27 = smov %s1634_s14 }
 0x34e   :  { %19 = sbr.rel (!%p1522_p8) target bundleno = 15 (0xf), region = 104 }
 0x355   :  { %577 = vsyncpa [#allocation4], 1 }
 0x356   :  { %579 = vsyncpa [#allocation4 + $0x1], 1 }
 0x357   :  { %580 = vsyncpa [#allocation6], 1 }
 0x358   :  { %582 = vsyncpa [#allocation6 + $0x1], 1 }

</bundles_post_ra>
